<compile_context>
chip_gen: v7x
topology: tpu7x:2x2x1
jax: 0.10.0
libtpu: 0.0.40
codegen_flags: <defaults>
</compile_context>

<pallas_src>
import jax
import jax.numpy as jnp
from jax.experimental import pallas as pl
from jax.experimental.pallas import tpu as pltpu

HIDDEN = 128        # hidden width of the DQN
TB_MAX = 4096       # max batch tile; working set ~8 MiB, safe on v5e/v6e/v7x
SPLIT_MIN_B = 512   # above this, force >=4 grid steps (v7x TC sharding + pipelining)
VPU_NOBS_MAX = 8    # layer-1 VPU rank-1 path / MXU crossover


def _round_up(x, m):
    return (x + m - 1) // m * m


def dqn_kernel(x_ref, w1_ref, b1_ref, w2_ref, b2_ref, w3_ref, b3_ref, o_ref):
    n_obs = x_ref.shape[1]

    # ---- layer 1 + ReLU (f32) ----
    if n_obs <= VPU_NOBS_MAX:
        # VPU path: n_obs rank-1 broadcast-FMA updates; avoids a mostly-empty
        # K<=8 MXU pass and any w1 / x feature padding.
        x = x_ref[...].astype(jnp.float32)        # (TB, n_obs)
        w1 = w1_ref[...]                          # (n_obs, H) f32
        h1 = b1_ref[...]                          # (1, H) f32, broadcasts up
        for k in range(n_obs):                    # static unroll
            h1 = h1 + x[:, k:k + 1] * w1[k:k + 1, :]
    else:
        h1 = jnp.dot(x_ref[...].astype(jnp.float32), w1_ref[...],
                     preferred_element_type=jnp.float32) + b1_ref[...]
    h1 = jnp.maximum(h1, 0.0)

    # ---- layer 2 + ReLU (bf16 MXU, f32 accumulate) ----
    h2 = jnp.dot(h1.astype(jnp.bfloat16), w2_ref[...],
                 preferred_element_type=jnp.float32) + b2_ref[...]
    h2 = jnp.maximum(h2, 0.0)

    # ---- layer 3 (no activation) ----
    out = jnp.dot(h2.astype(jnp.bfloat16), w3_ref[...],
                  preferred_element_type=jnp.float32) + b3_ref[...]
    o_ref[...] = out.astype(o_ref.dtype)


def prepare_params(params):
    """One-time conversion of f32 (in,out)-layout params to the kernel layout."""
    return {
        "w1": params["w1"].astype(jnp.float32),                  # (n_obs, H) f32
        "b1": params["b1"].reshape(1, -1).astype(jnp.float32),   # (1, H)
        "w2": params["w2"].astype(jnp.bfloat16),                 # (H, H)
        "b2": params["b2"].reshape(1, -1).astype(jnp.float32),   # (1, H)
        "w3": params["w3"].astype(jnp.bfloat16),                 # (H, n_actions)
        "b3": params["b3"].reshape(1, -1).astype(jnp.float32),   # (1, n_actions)
    }


def _choose_batch_tile(B):
    """Batch tile: single full-array block for small B; >=4 grid steps for large B
    so the "parallel" axis can shard over v7x's two TensorCores and BlockSpec
    double-buffering overlaps the x / out DMAs with compute."""
    if B < SPLIT_MIN_B:
        return B
    return min(TB_MAX, _round_up(pl.cdiv(B, 4), 128))


@jax.jit
def dqn_forward(x, prep):
    """x: (B, n_observations). prep: output of prepare_params()."""
    B, n_obs = x.shape
    n_actions = prep["w3"].shape[1]

    tb = _choose_batch_tile(B)
    grid = (pl.cdiv(B, tb),)   # ragged last block: OOB reads unused, stores masked

    const = lambda shape: pl.BlockSpec(shape, lambda i: (0, 0))

    flops = 2 * B * HIDDEN * (n_obs + HIDDEN + n_actions)
    bytes_accessed = int(
        B * n_obs * x.dtype.itemsize
        + B * n_actions * 4
        + sum(int(v.size) * v.dtype.itemsize for v in prep.values()))

    out = pl.pallas_call(
        dqn_kernel,
        out_shape=jax.ShapeDtypeStruct((B, n_actions), jnp.float32),
        grid=grid,
        in_specs=[
            pl.BlockSpec((tb, n_obs), lambda i: (i, 0)),   # x: tiled on batch
            const((n_obs, HIDDEN)),                        # w1 (VMEM-resident)
            const((1, HIDDEN)),                            # b1
            const((HIDDEN, HIDDEN)),                       # w2
            const((1, HIDDEN)),                            # b2
            const((HIDDEN, n_actions)),                    # w3
            const((1, n_actions)),                         # b3
        ],
        out_specs=pl.BlockSpec((tb, n_actions), lambda i: (i, 0)),
        compiler_params=pltpu.CompilerParams(
            dimension_semantics=("parallel",),   # shard batch steps over TCs (v7x)
            vmem_limit_bytes=32 * 1024 * 1024,   # safe on v5e/v6e/v7x
        ),
        cost_estimate=pl.CostEstimate(
            flops=flops, transcendentals=0, bytes_accessed=bytes_accessed),
    )(x, prep["w1"], prep["b1"], prep["w2"], prep["b2"], prep["w3"], prep["b3"])

    return out


def init_dqn_params(key, n_observations, n_actions):
    """Deterministic synthetic init. Weights stored transposed: (in, out)."""
    k1, k2, k3, k4, k5, k6 = jax.random.split(key, 6)
    s1 = 1.0 / jnp.sqrt(n_observations)
    s2 = 1.0 / jnp.sqrt(HIDDEN)
    u = jax.random.uniform
    return {
        "w1": u(k1, (n_observations, HIDDEN), jnp.float32, -s1, s1),
        "b1": u(k2, (HIDDEN,), jnp.float32, -s1, s1),
        "w2": u(k3, (HIDDEN, HIDDEN), jnp.float32, -s2, s2),
        "b2": u(k4, (HIDDEN,), jnp.float32, -s2, s2),
        "w3": u(k5, (HIDDEN, n_actions), jnp.float32, -s2, s2),
        "b3": u(k6, (n_actions,), jnp.float32, -s2, s2),
    }


def dqn_ref_f32(x, params):
    h1 = jnp.maximum(x @ params["w1"] + params["b1"], 0.0)
    h2 = jnp.maximum(h1 @ params["w2"] + params["b2"], 0.0)
    return h2 @ params["w3"] + params["b3"]


def dqn_ref_quant(x, prep):
    """Reference mimicking the kernel precision (f32 layer 1, bf16 layers 2/3)."""
    f32 = lambda a: a.astype(jnp.float32)
    bf = lambda a: a.astype(jnp.bfloat16)
    h1 = jnp.maximum(f32(x) @ prep["w1"] + prep["b1"], 0.0)
    h2 = jnp.maximum(f32(bf(h1)) @ f32(prep["w2"]) + prep["b2"], 0.0)
    return f32(bf(h2)) @ f32(prep["w3"]) + prep["b3"]


if __name__ == "__main__":
    n_observations = 4   # e.g. CartPole observation dim
    n_actions = 2
    batch = 2

    key = jax.random.PRNGKey(0)
    kx, kp, kx2 = jax.random.split(key, 3)
    x = jax.random.normal(kx, (batch, n_observations), jnp.float32)
    params = init_dqn_params(kp, n_observations, n_actions)
    prep = prepare_params(params)   # one-time param prep, outside the forward

    out = jax.block_until_ready(dqn_forward(x, prep))
    assert out.shape == (batch, n_actions), out.shape
    ref_q = dqn_ref_quant(x, prep)       # matches kernel precision
    ref_f = dqn_ref_f32(x, params)       # pure-f32 PyTorch-equivalent reference
    assert jnp.allclose(out, ref_q, atol=2e-3, rtol=2e-3), jnp.max(jnp.abs(out - ref_q))
    assert jnp.allclose(out, ref_f, atol=5e-2, rtol=5e-2), jnp.max(jnp.abs(out - ref_f))

    # Exercise the multi-step grid (TC-shardable on v7x) and the ragged last block.
    batch2 = 600   # tb = 256 -> grid = 3, last block ragged (masked stores)
    x2 = jax.random.normal(kx2, (batch2, n_observations), jnp.float32)
    out2 = jax.block_until_ready(dqn_forward(x2, prep))
    assert out2.shape == (batch2, n_actions), out2.shape
    ref2 = dqn_ref_quant(x2, prep)
    assert jnp.allclose(out2, ref2, atol=2e-3, rtol=2e-3), jnp.max(jnp.abs(out2 - ref2))

    print("KERNEL_OK")
</pallas_src>

<mosaic_0001>
module attributes {stable_mosaic.version = 11 : i64} {
  func.func @dqn_kernel(%arg0: i32, %arg1: memref<2x4xf32, #tpu.memory_space<vmem>>, %arg2: memref<4x128xf32, #tpu.memory_space<vmem>>, %arg3: memref<1x128xf32, #tpu.memory_space<vmem>>, %arg4: memref<128x128xbf16, #tpu.memory_space<vmem>>, %arg5: memref<1x128xf32, #tpu.memory_space<vmem>>, %arg6: memref<128x2xbf16, #tpu.memory_space<vmem>>, %arg7: memref<1x2xf32, #tpu.memory_space<vmem>>, %arg8: memref<2x2xf32, #tpu.memory_space<vmem>>) attributes {dimension_semantics = [#tpu.dimension_semantics<parallel>], iteration_bounds = array<i64: 1>, scalar_prefetch = 0 : i64, scratch_operands = 0 : i64, tpu.core_type = #tpu.core_type<tc>, window_params = [{transform_indices = @transform_0, window_bounds = array<i64: 2, 4>}, {pipeline_mode = #tpu.pipeline_mode<synchronous>, transform_indices = @transform_1, window_bounds = array<i64: 4, 128>}, {pipeline_mode = #tpu.pipeline_mode<synchronous>, transform_indices = @transform_2, window_bounds = array<i64: 1, 128>}, {pipeline_mode = #tpu.pipeline_mode<synchronous>, transform_indices = @transform_3, window_bounds = array<i64: 128, 128>}, {pipeline_mode = #tpu.pipeline_mode<synchronous>, transform_indices = @transform_4, window_bounds = array<i64: 1, 128>}, {pipeline_mode = #tpu.pipeline_mode<synchronous>, transform_indices = @transform_5, window_bounds = array<i64: 128, 2>}, {pipeline_mode = #tpu.pipeline_mode<synchronous>, transform_indices = @transform_6, window_bounds = array<i64: 1, 2>}, {transform_indices = @transform_7, window_bounds = array<i64: 2, 2>}]} {
    %c0 = arith.constant 0 : index
    %c0_0 = arith.constant 0 : index
    %0 = vector.load %arg1[%c0, %c0_0] : memref<2x4xf32, #tpu.memory_space<vmem>>, vector<2x4xf32>
    %c0_1 = arith.constant 0 : index
    %c0_2 = arith.constant 0 : index
    %1 = vector.load %arg2[%c0_1, %c0_2] : memref<4x128xf32, #tpu.memory_space<vmem>>, vector<4x128xf32>
    %c0_3 = arith.constant 0 : index
    %c0_4 = arith.constant 0 : index
    %2 = vector.load %arg3[%c0_3, %c0_4] : memref<1x128xf32, #tpu.memory_space<vmem>>, vector<1x128xf32>
    %3 = vector.extract_strided_slice %0 {offsets = [0, 0], sizes = [2, 1], strides = [1, 1]} : vector<2x4xf32> to vector<2x1xf32>
    %4 = vector.extract_strided_slice %1 {offsets = [0, 0], sizes = [1, 128], strides = [1, 1]} : vector<4x128xf32> to vector<1x128xf32>
    %5 = vector.broadcast %3 : vector<2x1xf32> to vector<2x128xf32>
    %6 = vector.broadcast %4 : vector<1x128xf32> to vector<2x128xf32>
    %7 = arith.mulf %5, %6 : vector<2x128xf32>
    %8 = vector.broadcast %2 : vector<1x128xf32> to vector<2x128xf32>
    %9 = arith.addf %8, %7 : vector<2x128xf32>
    %10 = vector.extract_strided_slice %0 {offsets = [0, 1], sizes = [2, 1], strides = [1, 1]} : vector<2x4xf32> to vector<2x1xf32>
    %11 = vector.extract_strided_slice %1 {offsets = [1, 0], sizes = [1, 128], strides = [1, 1]} : vector<4x128xf32> to vector<1x128xf32>
    %12 = vector.broadcast %10 : vector<2x1xf32> to vector<2x128xf32>
    %13 = vector.broadcast %11 : vector<1x128xf32> to vector<2x128xf32>
    %14 = arith.mulf %12, %13 : vector<2x128xf32>
    %15 = arith.addf %9, %14 : vector<2x128xf32>
    %16 = vector.extract_strided_slice %0 {offsets = [0, 2], sizes = [2, 1], strides = [1, 1]} : vector<2x4xf32> to vector<2x1xf32>
    %17 = vector.extract_strided_slice %1 {offsets = [2, 0], sizes = [1, 128], strides = [1, 1]} : vector<4x128xf32> to vector<1x128xf32>
    %18 = vector.broadcast %16 : vector<2x1xf32> to vector<2x128xf32>
    %19 = vector.broadcast %17 : vector<1x128xf32> to vector<2x128xf32>
    %20 = arith.mulf %18, %19 : vector<2x128xf32>
    %21 = arith.addf %15, %20 : vector<2x128xf32>
    %22 = vector.extract_strided_slice %0 {offsets = [0, 3], sizes = [2, 1], strides = [1, 1]} : vector<2x4xf32> to vector<2x1xf32>
    %23 = vector.extract_strided_slice %1 {offsets = [3, 0], sizes = [1, 128], strides = [1, 1]} : vector<4x128xf32> to vector<1x128xf32>
    %24 = vector.broadcast %22 : vector<2x1xf32> to vector<2x128xf32>
    %25 = vector.broadcast %23 : vector<1x128xf32> to vector<2x128xf32>
    %26 = arith.mulf %24, %25 : vector<2x128xf32>
    %27 = arith.addf %21, %26 : vector<2x128xf32>
    %cst = arith.constant 0.000000e+00 : f32
    %28 = vector.broadcast %cst : f32 to vector<2x128xf32>
    %29 = arith.maximumf %27, %28 : vector<2x128xf32>
    %30 = arith.truncf %29 : vector<2x128xf32> to vector<2x128xbf16>
    %c0_5 = arith.constant 0 : index
    %c0_6 = arith.constant 0 : index
    %31 = vector.load %arg4[%c0_5, %c0_6] : memref<128x128xbf16, #tpu.memory_space<vmem>>, vector<128x128xbf16>
    %cst_7 = arith.constant dense<0.000000e+00> : vector<2x128xf32>
    %32 = tpu.matmul %30, %31, %cst_7 {dimension_numbers = #tpu.dot_dimension_numbers<[1], [0], [0], [1], [0, 0, 1, 1], [], []>} : vector<2x128xbf16>, vector<128x128xbf16>, vector<2x128xf32> -> vector<2x128xf32>
    %c0_8 = arith.constant 0 : index
    %c0_9 = arith.constant 0 : index
    %33 = vector.load %arg5[%c0_8, %c0_9] : memref<1x128xf32, #tpu.memory_space<vmem>>, vector<1x128xf32>
    %34 = vector.broadcast %33 : vector<1x128xf32> to vector<2x128xf32>
    %35 = arith.addf %32, %34 : vector<2x128xf32>
    %cst_10 = arith.constant 0.000000e+00 : f32
    %36 = vector.broadcast %cst_10 : f32 to vector<2x128xf32>
    %37 = arith.maximumf %35, %36 : vector<2x128xf32>
    %38 = arith.truncf %37 : vector<2x128xf32> to vector<2x128xbf16>
    %c0_11 = arith.constant 0 : index
    %c0_12 = arith.constant 0 : index
    %39 = vector.load %arg6[%c0_11, %c0_12] : memref<128x2xbf16, #tpu.memory_space<vmem>>, vector<128x2xbf16>
    %cst_13 = arith.constant dense<0.000000e+00> : vector<2x2xf32>
    %40 = tpu.matmul %38, %39, %cst_13 {dimension_numbers = #tpu.dot_dimension_numbers<[1], [0], [0], [1], [0, 0, 1, 1], [], []>} : vector<2x128xbf16>, vector<128x2xbf16>, vector<2x2xf32> -> vector<2x2xf32>
    %c0_14 = arith.constant 0 : index
    %c0_15 = arith.constant 0 : index
    %41 = vector.load %arg7[%c0_14, %c0_15] : memref<1x2xf32, #tpu.memory_space<vmem>>, vector<1x2xf32>
    %42 = vector.broadcast %41 : vector<1x2xf32> to vector<2x2xf32>
    %43 = arith.addf %40, %42 : vector<2x2xf32>
    %c0_16 = arith.constant 0 : index
    %c0_17 = arith.constant 0 : index
    %44 = vector.load %arg8[%c0_16, %c0_17] : memref<2x2xf32, #tpu.memory_space<vmem>>, vector<2x2xf32>
    tpu.vector_store %arg8[%c0_16, %c0_17], %43 {strides = array<i32>} : memref<2x2xf32, #tpu.memory_space<vmem>>, vector<2x2xf32>,
    return
  }
  func.func @transform_0(%arg0: i32) -> (i32, i32) {
    %c0_i32 = arith.constant 0 : i32
    %c0_i32_0 = arith.constant 0 : i32
    return %arg0, %c0_i32 : i32, i32
  }
  func.func @transform_1(%arg0: i32) -> (i32, i32) {
    %c0_i32 = arith.constant 0 : i32
    %c0_i32_0 = arith.constant 0 : i32
    %c0_i32_1 = arith.constant 0 : i32
    return %c0_i32, %c0_i32_0 : i32, i32
  }
  func.func @transform_2(%arg0: i32) -> (i32, i32) {
    %c0_i32 = arith.constant 0 : i32
    %c0_i32_0 = arith.constant 0 : i32
    %c0_i32_1 = arith.constant 0 : i32
    return %c0_i32, %c0_i32_0 : i32, i32
  }
  func.func @transform_3(%arg0: i32) -> (i32, i32) {
    %c0_i32 = arith.constant 0 : i32
    %c0_i32_0 = arith.constant 0 : i32
    %c0_i32_1 = arith.constant 0 : i32
    return %c0_i32, %c0_i32_0 : i32, i32
  }
  func.func @transform_4(%arg0: i32) -> (i32, i32) {
    %c0_i32 = arith.constant 0 : i32
    %c0_i32_0 = arith.constant 0 : i32
    %c0_i32_1 = arith.constant 0 : i32
    return %c0_i32, %c0_i32_0 : i32, i32
  }
  func.func @transform_5(%arg0: i32) -> (i32, i32) {
    %c0_i32 = arith.constant 0 : i32
    %c0_i32_0 = arith.constant 0 : i32
    %c0_i32_1 = arith.constant 0 : i32
    return %c0_i32, %c0_i32_0 : i32, i32
  }
  func.func @transform_6(%arg0: i32) -> (i32, i32) {
    %c0_i32 = arith.constant 0 : i32
    %c0_i32_0 = arith.constant 0 : i32
    %c0_i32_1 = arith.constant 0 : i32
    return %c0_i32, %c0_i32_0 : i32, i32
  }
  func.func @transform_7(%arg0: i32) -> (i32, i32) {
    %c0_i32 = arith.constant 0 : i32
    %c0_i32_0 = arith.constant 0 : i32
    return %arg0, %c0_i32 : i32, i32
  }
}

</mosaic_0001>

<bundles_post_ra>
// kernel: dqn_forward.1
= control target key start
LH: loop header
LB: loop body
LE: loop exit
PB: predicated region body
PF: predicated region fallthrough
CT: control target
= control target key end

     0   :  { %v449_v1 = vmov 0   ;;  %v450_v2 = vmov 2   ;;  %v451_v4 = vmov 0.0   ;;  %v452_v6 = vmov 1   ;;  %s589_s0 = inlined_call_operand.vmem [shape: f32[2,4], index: 0, kind: input, shape index: {}]   ;;  %s590_s1 = inlined_call_operand.vmem [shape: f32[4,128], index: 1, kind: input, shape index: {}]   ;;  %s591_s2 = inlined_call_operand.vmem [shape: f32[1,128], index: 2, kind: input, shape index: {}]   ;;  %s592_s3 = inlined_call_operand.vmem [shape: bf16[128,128], index: 3, kind: input, shape index: {}]   ;;  %s593_s4 = inlined_call_operand.vmem [shape: f32[1,128], index: 4, kind: input, shape index: {}]   ;;  %s594_s5 = inlined_call_operand.vmem [shape: bf16[128,2], index: 5, kind: input, shape index: {}]   ;;  %s595_s6 = inlined_call_operand.vmem [shape: f32[1,2], index: 6, kind: input, shape index: {}]   ;;  %s596_s7 = inlined_call_operand.hbm [shape: f32[2,2], index: 7, kind: output, shape index: {}]  }
   0x1   :  { %v28_v0 = vld [vmem:[%s589_s0] sm:$0x3]  ;;  %404 = vset.pattern.permute.xlu0 %v449_v1  ;;  %406 = vset.pattern.permute.xlu1 %v450_v2  ;;  %v410_v5 = vld [vmem:[%s592_s3 + $0x8] sm:$0xff]   ;;  %v453_v7 = vmov 3   ;;  %v411_v8 = vld [vmem:[%s592_s3 + $0x10] sm:$0xff]  }
   0x2   :  { %v409_v3 = vld [vmem:[%s592_s3] sm:$0xff]   ;;  %33 = vperm.xlu0 %404, %v28_v0   ;;  %59 = vperm.xlu1 %406, %v28_v0   ;;  %v412_v9 = vld [vmem:[%s592_s3 + $0x18] sm:$0xff]  }
   0x3   :  { %357 = vmatprep.subr.bf16.mxu0 %v451_v4  ;;  %377 = vmatprep.subr.bf16.mxu1 %v451_v4 }
   0x4   :  { %358 = vmatpush3.bf16.msra.mxu0 %v409_v3 }
   0x5   :  { %359 = vmatprep.subr.bf16.mxu0 %v451_v4 }
   0x6   :  { %405 = vset.pattern.permute.xlu0 %v452_v6  ;;  %407 = vset.pattern.permute.xlu1 %v453_v7 }
   0x7   :  { %49 = vperm.xlu0 %405, %v28_v0   ;;  %69 = vperm.xlu1 %407, %v28_v0  }
   0x8   :  { %360 = vmatpush3.bf16.msra.mxu0 %v410_v5 }
   0x9   :  { %361 = vmatprep.subr.bf16.mxu0 %v451_v4 }
   0xb   :  { %408 = vset.pattern.permute.xlu0 %v453_v7 }
   0xc   :  { %362 = vmatpush3.bf16.msra.mxu0 %v411_v8 }
   0xd   :  { %363 = vmatprep.subr.bf16.mxu0 %v451_v4 }
   0xe   :  { %12 = vsyncpa [#allocation3], 0  ;;  %v413_v10 = vld [vmem:[%s592_s3 + $0x20] sm:$0xff]   ;;  %vm454_vm0 = vmmov 0   ;;  %v414_v12 = vld [vmem:[%s592_s3 + $0x28] sm:$0xff]   ;;  %v36_v20 = vlaneseq  ;;  %s455_s15 = smov [#allocation2]  }
   0xf   :  { %373 = vmatprep.mubr.msk.bf16.mxu0 %vm454_vm0, %v451_v4  ;;  %393 = vmatprep.mubr.msk.bf16.mxu1 %vm454_vm0, %v451_v4  ;;  %v417_v11 = vld [vmem:[%s594_s5] sm:$0xff]   ;;  %v418_v13 = vld [vmem:[%s594_s5 + $0x8] sm:$0xff]   ;;  %v415_v14 = vld [vmem:[%s592_s3 + $0x30] sm:$0xff]   ;;  %s312_s16 = sshll.u32 %s455_s15, 4  ;;  %vm304_vm1 = vcmask 9216   ;;  %s313_s16 = int_to_ptr.vmem [resolvable:$true] %s312_s16 }
  0x10   :  { %364 = vmatpush3.bf16.msra.mxu0 %v412_v9  ;;  %378 = vmatpush3.bf16.msra.mxu1 %v417_v11  ;;  %v419_v15 = vld [vmem:[%s594_s5 + $0x10] sm:$0xff]   ;;  %v416_v16 = vld [vmem:[%s592_s3 + $0x38] sm:$0xff]   ;;  %v421_v18 = vld [vmem:[%s594_s5 + $0x20] sm:$0xff]   ;;  %v37_v21 = vshrl.u32 %v36_v20, 7  ;;  %p430_p1 = scmp.lt.s32.totalorder %s313_s16, %s313_s16 }
  0x11   :  { %365 = vmatprep.subr.bf16.mxu0 %v451_v4  ;;  %379 = vmatprep.subr.bf16.mxu1 %v451_v4  ;;  %v420_v17 = vld [vmem:[%s594_s5 + $0x18] sm:$0xff]   ;;  %v422_v19 = vld [vmem:[%s594_s5 + $0x28] sm:$0xff]   ;;  %v29_v23 = vld [vmem:[%s590_s1] sm:$0xf] }
  0x12   :  { %v38_v22 = vsub.s32 0, %v37_v21  ;;  %v54_v25 = vsub.s32 1, %v37_v21  ;;  %v64_v27 = vsub.s32 2, %v37_v21  ;;  %v74_v29 = vsub.s32 3, %v37_v21  ;;  %v320_v32 = vld [vmem:[%s591_s2] ss:$0 sm:$0xff] }
  0x13   :  { %v423_v46 = vld [vmem:[%s594_s5 + $0x30] sm:$0xff]   ;;  %v424_v47 = vld [vmem:[%s594_s5 + $0x38] sm:$0xff]   ;;  %v321_v48 = vld [vmem:[%s593_s4] ss:$0 sm:$0xff]  ;;  %s425_s4 = scalar_lea.vmem %s313_s16, 32 }
  0x14   :  { %366 = vmatpush3.bf16.msra.mxu0 %v413_v10  ;;  %380 = vmatpush3.bf16.msra.mxu1 %v418_v13  ;;  %v39_v24 = vrot.slane %v29_v23, %v38_v22  ;;  %v55_v31 = vrot.slane %v29_v23, %v54_v25  ;;  %v65_v33 = vrot.slane %v29_v23, %v64_v27  ;;  %v330_v56 = vld [vmem:[%s595_s6] ss:$0 sm:$0xff]  ;;  %p426_p0 = scmp.ne.s32.totalorder %s313_s16, %s425_s4  ;;  %p431_p2 = scmp.lt.s32.totalorder %s425_s4, %s425_s4 }
  0x15   :  { %367 = vmatprep.subr.bf16.mxu0 %v451_v4  ;;  %381 = vmatprep.subr.bf16.mxu1 %v451_v4  ;;  %v75_v34 = vrot.slane %v29_v23, %v74_v29 }
  0x16   :  { %p432_p3 = por %p431_p2, %p430_p1 }
  0x18   :  { %368 = vmatpush3.bf16.msra.mxu0 %v414_v12  ;;  %382 = vmatpush3.bf16.msra.mxu1 %v419_v15  ;;  %p433_p4 = pnand %p432_p3, %p426_p0 }
  0x19   :  { %369 = vmatprep.subr.bf16.mxu0 %v451_v4  ;;  %383 = vmatprep.subr.bf16.mxu1 %v451_v4 }
  0x1c   :  { %370 = vmatpush3.bf16.msra.mxu0 %v415_v14  ;;  %384 = vmatpush3.bf16.msra.mxu1 %v420_v17 }
  0x1d   :  { %371 = vmatprep.subr.bf16.mxu0 %v451_v4  ;;  %385 = vmatprep.subr.bf16.mxu1 %v451_v4 }
  0x20   :  { %372 = vmatpush3.bf16.msra.mxu0 %v416_v16  ;;  %386 = vmatpush3.bf16.msra.mxu1 %v421_v18 }
  0x21   :  { %387 = vmatprep.subr.bf16.mxu1 %v451_v4 }
  0x24   :  { %388 = vmatpush3.bf16.msra.mxu1 %v422_v19 }
  0x25   :  { %389 = vmatprep.subr.bf16.mxu1 %v451_v4 }
  0x28   :  { %390 = vmatpush3.bf16.msra.mxu1 %v423_v46 }
  0x29   :  { %391 = vmatprep.subr.bf16.mxu1 %v451_v4 }
  0x2c   :  { %392 = vmatpush3.bf16.msra.mxu1 %v424_v47 }
  0x81   :  { %v34_v26 = vpop.permute.xlu0 %33  ;;  %v60_v28 = vpop.permute.xlu1 %59 }
  0x82   :  { %v40_v30 = vmul.f32 %v39_v24, %v34_v26  ;;  %v66_v39 = vmul.f32 %v65_v33, %v60_v28 }
  0x84   :  { %v47_v37 = vadd.f32 %v320_v32, %v40_v30 }
  0x86   :  { %v50_v35 = vpop.permute.xlu0 %49  ;;  %v70_v36 = vpop.permute.xlu1 %69 }
  0x87   :  { %v56_v38 = vmul.f32 %v55_v31, %v50_v35  ;;  %v76_v41 = vmul.f32 %v75_v34, %v70_v36 }
  0x89   :  { %v57_v40 = vadd.f32 %v56_v38, %v47_v37 }
  0x8b   :  { %v67_v42 = vadd.f32 %v66_v39, %v57_v40 }
  0x8d   :  { %v77_v43 = vadd.f32 %v76_v41, %v67_v42 }
  0x8f   :  { %v78_v44 = vmax.f32 %v77_v43, 0.0 }
  0x91   :  { %v79_v45 = vpack.c.bf16 %v78_v44, %v78_v44 }
  0x93   :  { %374 = vmatmul.mubr.bf16.vlgmr.msra.gmra.mrb[0].mxu0 %v79_v45 }
 0x166   :  { %v185_v49 = vpop.f32.mrb[0].mxu0 }
 0x167   :  { %v186_v50 = vadd.f32 %v321_v48, %v185_v49  ;;  %v375_v51 = vpop.f32.mrb[1].mxu0 }
 0x168   :  { %v188_v52 = vpop.f32.mrb[2].mxu0 }
 0x169   :  { %v191_v53 = vmax.f32 %v186_v50, 0.0  ;;  %v376_v54 = vpop.f32.mrb[3].mxu0 }
 0x16b   :  { %v192_v55 = vpack.c.bf16 %v191_v53, %v191_v53 }
 0x16d   :  { %394 = vmatmul.mubr.bf16.vlgmr.msra.gmra.mrb[0].mxu1 %v192_v55 }
 0x240   :  { %v298_v57 = vpop.f32.mrb[0].mxu1 }
 0x241   :  { %v299_v58 = vadd.f32 %v330_v56, %v298_v57  ;;  %v395_v59 = vpop.f32.mrb[1].mxu1 }
 0x242   :  { %v301_v60 = vpop.f32.mrb[2].mxu1 }
 0x243   :  { %v396_v61 = vpop.f32.mrb[3].mxu1  ;;  %305 = vst.msk [vmem:[#allocation2] sm:$0x3] %vm304_vm1, %v299_v58 }
 0x244   :  { %436 = shalt.err (!%p433_p4)
}
 0x245   :  { %s437_s6 = scalar_lea.hbm %s596_s7, 32 }
 0x246   :  { %p438_p5 = scmp.ne.s32.totalorder %s596_s7, %s437_s6  ;;  %p441_p6 = scmp.lt.u32.totalorder %s437_s6, %s596_s7 }
 0x248   :  { %p443_p7 = pnand %p441_p6, %p438_p5 }
 0x24a   :  { %446 = shalt.err (!%p443_p7)
}
 0x24b   :  { %315 = dma.vmem_to_hbm [thread:$0]  %s313_s16, 32, %s596_s7, [#allocation3]  }
 0x24c   :  { %447 = dma.done.wait [#allocation3], 32  }
 0x24d   :  { %448 = vsyncadd [#allocation3], 4294967264 }
 0x24e   :  { %319 = vsyncpa [#allocation3], 1 }

</bundles_post_ra>
